<compile_context>
chip_gen: v5e
topology: v5e:2x2
jax: 0.10.0
libtpu: 0.0.40
codegen_flags: <defaults>
</compile_context>

<pallas_src>
import jax
import jax.numpy as jnp
from jax.experimental import pallas as pl
from jax.experimental.pallas import tpu as pltpu


def ted_kernel(x_ref, p_ref, c_ref, out_ref):
    """x_ref: (TB, 2F) streamed block; p_ref: (8, F) packed params;
    c_ref: (1, 1) scalar in SMEM; out_ref: (1, TB) lane-dense output row."""
    F = p_ref.shape[1]
    # Lane-aligned static slices of the streamed (TB, 2F) block (F % 128 == 0).
    x0 = x_ref[:, 0:F]           # inputs[:, 0, :]
    x1 = x_ref[:, F:2 * F]       # inputs[:, 1, :]

    p = p_ref[...]               # (8, F): rows = W0, W1, b, W_bar, b_bar, 0, 0, 0
    w0 = p[0:1, :]
    w1 = p[1:2, :]
    b = p[2:3, :]
    wbar = p[3:4, :]
    bbar = p[4:5, :]

    # x = |sum over pair-dim of (W * inputs) + b| ;  y = (W_bar * in0 + b_bar)^2
    x = jnp.abs(x0 * w0 + x1 * w1 + b)       # (TB, F)
    y = jnp.square(x0 * wbar + bbar)         # (TB, F)

    # Feature reduction (lanes) -> (TB,), then relayout to a lane-dense (1, TB)
    # row so the per-step output writes are dense vst's / a linear writeback DMA.
    # TODO(synk): if a v7x bundle shows VPU/XLU as the binding slot, move this
    # reduce onto the idle MXU: jnp.dot(x - y, ones((F, 1)), preferred_element_type=f32).
    vals = jnp.sum(x - y, axis=1) + c_ref[0, 0]   # (TB,)
    out_ref[...] = vals.reshape(1, -1)            # (1, TB)


def _round_down(a, m):
    return (a // m) * m


def ted_classifier_forward(inputs, W, b, W_bar, b_bar, c, *,
                           block_bytes=8 * 1024 * 1024):
    """inputs: (B, 2, F) float32, F a multiple of 128. Returns (B,) float32."""
    B, P, F = inputs.shape
    assert P == 2
    assert F % 128 == 0, "feature_dim must be a multiple of 128 for lane slicing"

    x = inputs.reshape(B, 2 * F)          # free, contiguous view of the pair

    # Pack the five (1, F) parameter rows into one sublane-tile-aligned block.
    params = jnp.concatenate(
        [W.astype(jnp.float32), b.astype(jnp.float32),
         W_bar.astype(jnp.float32), b_bar.astype(jnp.float32),
         jnp.zeros((3, F), jnp.float32)], axis=0)          # (8, F)
    c = c.astype(jnp.float32)

    # Only tiny batches (< one sublane tile) get padded; otherwise the grid's
    # partial last block handles B % TB != 0 with no extra HBM traffic.
    bk = B
    if bk < 8:
        x = jnp.pad(x, ((0, 8 - bk), (0, 0)))
        bk = 8

    # Batch tile: multiple of 128 rows (lane-dense output row) targeting
    # ~block_bytes of streamed input per grid step, clipped for small batches.
    row_bytes = 2 * F * 4
    tb = max(128, _round_down(block_bytes // row_bytes, 128))
    if tb >= bk:
        tb = bk if bk % 8 == 0 else _round_down(bk, 8)
    num_blocks = pl.cdiv(bk, tb)

    out = pl.pallas_call(
        ted_kernel,
        out_shape=jax.ShapeDtypeStruct((num_blocks, tb), jnp.float32),
        grid=(num_blocks,),
        in_specs=[
            pl.BlockSpec((tb, 2 * F), lambda i: (i, 0)),          # streamed input
            pl.BlockSpec((8, F), lambda i: (0, 0)),               # params, VMEM-resident
            pl.BlockSpec(memory_space=pltpu.MemorySpace.SMEM),    # scalar c
        ],
        out_specs=pl.BlockSpec((1, tb), lambda i: (i, 0)),        # lane-dense rows
        compiler_params=pltpu.CompilerParams(
            dimension_semantics=("parallel",),        # v7x: shard batch over 2 TCs
            vmem_limit_bytes=48 * 1024 * 1024,        # fits v7x 64 MiB physical VMEM
        ),
    )(x, params, c)
    # Flatten (num_blocks, tb) -> (num_blocks*tb,) and drop padded/garbage tail.
    return out.reshape(-1)[:B]


def make_params(key, feature_dim):
    """Deterministic synthetic params (unit-norm rows, c = 1) mimicking
    the shapes of the orthogonal_-initialized PyTorch parameters."""
    k1, k2, k3, k4 = jax.random.split(key, 4)

    def unit_rows(k, n):
        v = jax.random.normal(k, (n, feature_dim), jnp.float32)
        return v / jnp.linalg.norm(v, axis=1, keepdims=True)

    W = unit_rows(k1, 2)          # (2, F)
    b = unit_rows(k2, 1)          # (1, F)
    W_bar = unit_rows(k3, 1)      # (1, F)
    b_bar = unit_rows(k4, 1)      # (1, F)
    c = jnp.ones((1, 1), jnp.float32)   # orthogonal_ of (1,1) is +/-1
    return W, b, W_bar, b_bar, c


def reference_forward(inputs, W, b, W_bar, b_bar, c):
    x = W[None, :, :] * inputs                          # (B, 2, F)
    x = jnp.sum(x, axis=1) + b                          # (B, F)
    x = jnp.abs(x)
    y = jnp.square(W_bar * inputs[:, 0, :] + b_bar)     # (B, F)
    return jnp.sum(x - y, axis=1) + c[0, 0]             # (B,)


if __name__ == "__main__":
    key = jax.random.PRNGKey(0)
    k_in, k_par, k_in2, k_in3 = jax.random.split(key, 4)

    F = 128
    W, b, W_bar, b_bar, c = make_params(k_par, F)

    # Case 1: small batch, single full block.
    B = 8
    inputs = jax.random.normal(k_in, (B, 2, F), jnp.float32)
    out = jax.block_until_ready(
        ted_classifier_forward(inputs, W, b, W_bar, b_bar, c))
    ref = reference_forward(inputs, W, b, W_bar, b_bar, c)
    assert out.shape == (B,)
    assert jnp.allclose(out, ref, atol=1e-3, rtol=1e-4), (out, ref)

    # Case 2: batch not a multiple of the tile -> multi-step grid with a
    # partial last block and NO wrapper padding (tb = 16, blocks [0:16),[16:20)).
    B2 = 20
    inputs2 = jax.random.normal(k_in2, (B2, 2, F), jnp.float32)
    out2 = jax.block_until_ready(
        ted_classifier_forward(inputs2, W, b, W_bar, b_bar, c))
    ref2 = reference_forward(inputs2, W, b, W_bar, b_bar, c)
    assert out2.shape == (B2,)
    assert jnp.allclose(out2, ref2, atol=1e-3, rtol=1e-4), (out2, ref2)

    # Case 3: B < 8 -> tiny-pad fallback path.
    B3 = 5
    inputs3 = jax.random.normal(k_in3, (B3, 2, F), jnp.float32)
    out3 = jax.block_until_ready(
        ted_classifier_forward(inputs3, W, b, W_bar, b_bar, c))
    ref3 = reference_forward(inputs3, W, b, W_bar, b_bar, c)
    assert out3.shape == (B3,)
    assert jnp.allclose(out3, ref3, atol=1e-3, rtol=1e-4), (out3, ref3)

    print("KERNEL_OK")
</pallas_src>

<mosaic_0001>
module attributes {stable_mosaic.version = 11 : i64} {
  func.func @ted_kernel(%arg0: i32, %arg1: memref<8x256xf32, #tpu.memory_space<vmem>>, %arg2: memref<8x128xf32, #tpu.memory_space<vmem>>, %arg3: memref<1x1xf32, #tpu.memory_space<smem>>, %arg4: memref<1x8xf32, #tpu.memory_space<vmem>>) attributes {dimension_semantics = [#tpu.dimension_semantics<parallel>], iteration_bounds = array<i64: 1>, scalar_prefetch = 0 : i64, scratch_operands = 0 : i64, tpu.core_type = #tpu.core_type<tc>, window_params = [{transform_indices = @transform_0, window_bounds = array<i64: 8, 256>}, {pipeline_mode = #tpu.pipeline_mode<synchronous>, transform_indices = @transform_1, window_bounds = array<i64: 8, 128>}, {transform_indices = @transform_2, window_bounds = array<i64: 1, 1>}, {transform_indices = @transform_3, window_bounds = array<i64: 1, 8>}]} {
    %c0 = arith.constant 0 : index
    %c0_0 = arith.constant 0 : index
    %0 = vector.load %arg1[%c0, %c0_0] : memref<8x256xf32, #tpu.memory_space<vmem>>, vector<8x128xf32>
    %c0_1 = arith.constant 0 : index
    %c128 = arith.constant 128 : index
    %1 = vector.load %arg1[%c0_1, %c128] : memref<8x256xf32, #tpu.memory_space<vmem>>, vector<8x128xf32>
    %c0_2 = arith.constant 0 : index
    %c0_3 = arith.constant 0 : index
    %2 = vector.load %arg2[%c0_2, %c0_3] : memref<8x128xf32, #tpu.memory_space<vmem>>, vector<8x128xf32>
    %3 = vector.extract_strided_slice %2 {offsets = [0, 0], sizes = [1, 128], strides = [1, 1]} : vector<8x128xf32> to vector<1x128xf32>
    %4 = vector.extract_strided_slice %2 {offsets = [1, 0], sizes = [1, 128], strides = [1, 1]} : vector<8x128xf32> to vector<1x128xf32>
    %5 = vector.extract_strided_slice %2 {offsets = [2, 0], sizes = [1, 128], strides = [1, 1]} : vector<8x128xf32> to vector<1x128xf32>
    %6 = vector.extract_strided_slice %2 {offsets = [3, 0], sizes = [1, 128], strides = [1, 1]} : vector<8x128xf32> to vector<1x128xf32>
    %7 = vector.extract_strided_slice %2 {offsets = [4, 0], sizes = [1, 128], strides = [1, 1]} : vector<8x128xf32> to vector<1x128xf32>
    %8 = vector.broadcast %3 : vector<1x128xf32> to vector<8x128xf32>
    %9 = arith.mulf %0, %8 : vector<8x128xf32>
    %10 = vector.broadcast %4 : vector<1x128xf32> to vector<8x128xf32>
    %11 = arith.mulf %1, %10 : vector<8x128xf32>
    %12 = arith.addf %9, %11 : vector<8x128xf32>
    %13 = vector.broadcast %5 : vector<1x128xf32> to vector<8x128xf32>
    %14 = arith.addf %12, %13 : vector<8x128xf32>
    %15 = math.absf %14 : vector<8x128xf32>
    %16 = vector.broadcast %6 : vector<1x128xf32> to vector<8x128xf32>
    %17 = arith.mulf %0, %16 : vector<8x128xf32>
    %18 = vector.broadcast %7 : vector<1x128xf32> to vector<8x128xf32>
    %19 = arith.addf %17, %18 : vector<8x128xf32>
    %20 = arith.mulf %19, %19 : vector<8x128xf32>
    %21 = arith.subf %15, %20 : vector<8x128xf32>
    %cst = arith.constant dense<0.000000e+00> : vector<8xf32>
    %22 = vector.multi_reduction <add>, %21, %cst [1] : vector<8x128xf32> to vector<8xf32>
    %c0_4 = arith.constant 0 : index
    %c0_5 = arith.constant 0 : index
    %23 = memref.load %arg3[%c0_4, %c0_5] : memref<1x1xf32, #tpu.memory_space<smem>>
    %24 = vector.broadcast %23 : f32 to vector<8xf32>
    %25 = arith.addf %22, %24 : vector<8xf32>
    %26 = vector.shape_cast %25 : vector<8xf32> to vector<1x8xf32>
    %c0_6 = arith.constant 0 : index
    %c0_7 = arith.constant 0 : index
    %27 = vector.load %arg4[%c0_6, %c0_7] : memref<1x8xf32, #tpu.memory_space<vmem>>, vector<1x8xf32>
    tpu.vector_store %arg4[%c0_6, %c0_7], %26 {strides = array<i32>} : memref<1x8xf32, #tpu.memory_space<vmem>>, vector<1x8xf32>,
    return
  }
  func.func @transform_0(%arg0: i32) -> (i32, i32) {
    %c0_i32 = arith.constant 0 : i32
    %c0_i32_0 = arith.constant 0 : i32
    return %arg0, %c0_i32 : i32, i32
  }
  func.func @transform_1(%arg0: i32) -> (i32, i32) {
    %c0_i32 = arith.constant 0 : i32
    %c0_i32_0 = arith.constant 0 : i32
    %c0_i32_1 = arith.constant 0 : i32
    return %c0_i32, %c0_i32_0 : i32, i32
  }
  func.func @transform_2(%arg0: i32) -> (i32, i32) {
    %c0_i32 = arith.constant 0 : i32
    %c0_i32_0 = arith.constant 0 : i32
    %c0_i32_1 = arith.constant 0 : i32
    return %c0_i32, %c0_i32_0 : i32, i32
  }
  func.func @transform_3(%arg0: i32) -> (i32, i32) {
    %c0_i32 = arith.constant 0 : i32
    %c0_i32_0 = arith.constant 0 : i32
    return %arg0, %c0_i32 : i32, i32
  }
}

</mosaic_0001>

<bundles_post_ra>
// kernel: tpu_custom_call.1
= control target key start
LH: loop header
LB: loop body
LE: loop exit
PB: predicated region body
PF: predicated region fallthrough
CT: control target
= control target key end

     0   :  { %9 = vsyncpa [#allocation4], 0  ;;  %s207_s0 = inlined_call_operand.hbm [shape: f32[8,256], index: 0, kind: input, shape index: {}]   ;;  %s208_s1 = inlined_call_operand.hbm [shape: f32[8,128], index: 1, kind: input, shape index: {}]   ;;  %s209_s2 = inlined_call_operand.<no memory space> [shape: f32[1,1], index: 2, kind: input, shape index: {}]   ;;  %s210_s3 = inlined_call_operand.hbm [shape: f32[1,8], index: 3, kind: output, shape index: {}]  }
   0x1   :  { %10 = vsyncpa [#allocation7], 0 }
   0x2   :  { %11 = vsyncpa [#allocation5], 0  ;;  %s17_s14 = sshll.u32 %s207_s0, 4  ;;  %s172_s15 = smov [#allocation3]   ;;  %s18_s14 = int_to_ptr.hbm [resolvable:$true] %s17_s14 }
   0x3   :  { %s19_s16 = sshll.u32 %s172_s15, 4  ;;  %s28_s19 = sshll.u32 %s208_s1, 4  ;;  %s20_s16 = int_to_ptr.vmem [resolvable:$true] %s19_s16  ;;  %s29_s19 = int_to_ptr.hbm [resolvable:$true] %s28_s19 }
   0x4   :  { %22 = dma.hbm_to_vmem [thread:$0]  %s18_s14, 256, %s20_s16, [#allocation4]  }
   0x5   :  { %s173_s20 = smov [#allocation6]  }
   0x6   :  { %s30_s21 = sshll.u32 %s173_s20, 4  ;;  %s31_s21 = int_to_ptr.vmem [resolvable:$true] %s30_s21 }
   0x7   :  { %33 = dma.hbm_to_vmem [thread:$0]  %s29_s19, 128, %s31_s21, [#allocation7]  }
   0x8   :  { %166 = dma.done.wait [#allocation4], 256  }
   0x9   :  { %167 = vsyncadd [#allocation4], 4294967040 }
   0xa   :  { %168 = dma.done.wait [#allocation7], 128  }
   0xb   :  { %169 = vsyncadd [#allocation7], 4294967168  ;;  %v44_v0 = vld [vmem:[#allocation3] sm:$0xff]  ;;  %v45_v1 = vld [vmem:[#allocation3 + $0x8] sm:$0xff]  ;;  %v67_v17 = vlaneseq  ;;  %v64_v18 = vstv %s209_s2  ;;  %s174_s22 = smov [#allocation8]   ;;  %s80_s26 = sshll.u32 %s210_s3, 4  ;;  %s81_s26 = int_to_ptr.hbm [resolvable:$true] %s80_s26 }
   0xc   :  { %v46_v2 = vld [vmem:[#allocation6] sm:$0xff]  ;;  %s78_s23 = sshll.u32 %s174_s22, 4  ;;  %vm71_vm0 = vcmask 57344   ;;  %s79_s23 = int_to_ptr.vmem [resolvable:$true] %s78_s23 }
   0xd   :  { %v47_v3 = vperm.slane %v46_v2, 0  ;;  %v49_v4 = vperm.slane %v46_v2, 1  ;;  %v55_v5 = vperm.slane %v46_v2, 3  ;;  %v57_v6 = vperm.slane %v46_v2, 4 }
   0xe   :  { %v52_v9 = vperm.slane %v46_v2, 2  ;;  %v68_v19 = vand.u32 127, %v67_v17 }
   0xf   :  { %v48_v7 = vmul.f32 %v47_v3, %v44_v0  ;;  %v50_v8 = vmul.f32 %v49_v4, %v45_v1  ;;  %v56_v10 = vmul.f32 %v55_v5, %v44_v0 }
  0x11   :  { %v51_v11 = vadd.f32 %v50_v8, %v48_v7  ;;  %v58_v12 = vadd.f32 %v57_v6, %v56_v10 }
  0x13   :  { %v53_v13 = vadd.f32 %v52_v9, %v51_v11  ;;  %v59_v14 = vmul.f32 %v58_v12, %v58_v12 }
  0x15   :  { %v54_v15 = vand.u32 2147483647, %v53_v13 }
  0x17   :  { %v60_v16 = vsub.f32 %v54_v15, %v59_v14 }
  0x19   :  { %61 = vadd.xlane.f32.xlu0 %v60_v16 }
  0x8c   :  { %v62_v20 = vpop.xlane.xlu0 %61 }
  0x8d   :  { %v65_v21 = vadd.f32 %v64_v18, %v62_v20 }
  0x8f   :  { %v69_v22 = vperm.slane %v65_v21, %v68_v19 }
  0x91   :  { %72 = vst.msk [vmem:[#allocation8] sm:$0x1] %vm71_vm0, %v69_v22 }
  0x92   :  { %83 = dma.vmem_to_hbm [thread:$0]  %s79_s23, 16, %s81_s26, [#allocation5]  }
  0x93   :  { %170 = dma.done.wait [#allocation5], 16  }
  0x94   :  { %171 = vsyncadd [#allocation5], 4294967280 }
  0x95   :  { %88 = vsyncpa [#allocation4], 1 }
  0x96   :  { %89 = vsyncpa [#allocation7], 1 }
  0x97   :  { %90 = vsyncpa [#allocation5], 1 }

</bundles_post_ra>
